<compile_context>
chip_gen: v6e
topology: v6e:2x2x1
jax: 0.10.0
libtpu: 0.0.40
codegen_flags: <defaults>
</compile_context>

<pallas_src>
import functools
import math

import jax
import jax.numpy as jnp
from jax import lax
from jax.experimental import pallas as pl
from jax.experimental.pallas import tpu as pltpu


def _round_up(x, m):
    return (x + m - 1) // m * m


# f32 accumulator cap per grid step: 128 KiB (= 32 of the 64 4-KiB vregs).
_ACC_ELEMS = 32 * 1024


def _vmem_budget_bytes():
    """Generation-aware scoped-VMEM cap (tight on v7x's 64 MiB per-TC VMEM)."""
    phys = 64 << 20
    try:
        info = pltpu.get_tpu_info()
        phys = int(getattr(info, "vmem_capacity_bytes", phys))
    except Exception:
        pass
    return (28 << 20) if phys <= (64 << 20) else (48 << 20)


_VMEM_BUDGET = _vmem_budget_bytes()


# ---------------------------------------------------------------------------
# Pallas kernels
# ---------------------------------------------------------------------------
def _mm_bias_kernel(x_ref, w_ref, b_ref, o_ref, *, relu):
    # single-K-step matmul + fused bias (+ReLU); bf16 inputs, f32 accumulate
    acc = jnp.dot(x_ref[...], w_ref[...], preferred_element_type=jnp.float32)
    y = acc + b_ref[...]
    if relu:
        y = jnp.maximum(y, 0.0)
    o_ref[...] = y.astype(o_ref.dtype)


def _mm_bias_res_kernel(x_ref, w_ref, b_ref, r_ref, o_ref):
    # conv -> (folded BN) -> + residual -> ReLU   (Bottleneck tail)
    acc = jnp.dot(x_ref[...], w_ref[...], preferred_element_type=jnp.float32)
    y = acc + b_ref[...] + r_ref[...].astype(jnp.float32)
    o_ref[...] = jnp.maximum(y, 0.0).astype(o_ref.dtype)


# ---------------------------------------------------------------------------
# Tiling / Pallas wrapper
# ---------------------------------------------------------------------------
def _pick_tiles(M, N):
    """Return (Mp, TM, TN) for a full-K single-step GEMM.

    Rules: keep TM*TN <= 32768 (f32 accumulator <= 128 KiB -> no epilogue
    spills); collapse small-M GEMMs to one grid step by taking the full N;
    otherwise prefer a lane-dense TN (>=128) and the largest TM (<= 512).
    """
    Mp = _round_up(M, 8)
    if Mp * N <= _ACC_ELEMS:
        return Mp, Mp, N                       # single (1,1)-grid step
    if N <= 128:
        TN = N                                 # full (small) N
    else:
        TN = 128
        for cand in (512, 256):
            if N % cand == 0 and cand * min(Mp, 128) <= _ACC_ELEMS:
                TN = cand
                break
    if N % TN:                                 # safety for odd N (unused here)
        TN = N
    TM = max(8, min(Mp, 512, (_ACC_ELEMS // TN) // 8 * 8))
    Mp = _round_up(M, TM)
    return Mp, TM, TN


def matmul_bias(x, w, b, *, relu, residual=None):
    """x: (M, K) bf16, w: (K, N) bf16 (BN scale folded), b: (N,) f32."""
    M, K = x.shape
    N = w.shape[1]
    Mp, TM, TN = _pick_tiles(M, N)

    if Mp != M:
        x = jnp.pad(x, ((0, Mp - M), (0, 0)))
        if residual is not None:
            residual = jnp.pad(residual, ((0, Mp - M), (0, 0)))
    b2 = b.reshape(1, N).astype(jnp.float32)

    m_tiles, n_tiles = Mp // TM, N // TN
    # Adaptive ordering: the axis with more tiles goes first, so the outer
    # "parallel" axis is wide (megacore / 2-TC sharding on v7x).
    if m_tiles >= n_tiles:
        grid = (m_tiles, n_tiles)
        xmap = lambda i, j: (i, 0)
        wmap = lambda i, j: (0, j)
        bmap = lambda i, j: (0, j)
        omap = lambda i, j: (i, j)
    else:
        grid = (n_tiles, m_tiles)
        xmap = lambda j, i: (i, 0)
        wmap = lambda j, i: (0, j)
        bmap = lambda j, i: (0, j)
        omap = lambda j, i: (i, j)

    in_specs = [
        pl.BlockSpec((TM, K), xmap),
        pl.BlockSpec((K, TN), wmap),
        pl.BlockSpec((1, TN), bmap),
    ]
    args = [x, w, b2]
    if residual is not None:
        in_specs.append(pl.BlockSpec((TM, TN), omap))
        args.append(residual)
        kernel = _mm_bias_res_kernel
    else:
        kernel = functools.partial(_mm_bias_kernel, relu=relu)

    # VMEM: double-buffered bf16 x/w/out tiles (+ residual) + f32 bias + slack.
    est = 2 * 2 * (TM * K + K * TN + TM * TN) + 2 * 4 * TN
    if residual is not None:
        est += 2 * 2 * TM * TN
    vmem_limit = int(min(_VMEM_BUDGET, max(16 << 20, est + (4 << 20))))

    out = pl.pallas_call(
        kernel,
        out_shape=jax.ShapeDtypeStruct((Mp, N), jnp.bfloat16),
        grid_spec=pltpu.PrefetchScalarGridSpec(
            num_scalar_prefetch=0,
            grid=grid,
            in_specs=in_specs,
            out_specs=pl.BlockSpec((TM, TN), omap),
        ),
        compiler_params=pltpu.CompilerParams(
            dimension_semantics=("parallel", "parallel"),
            vmem_limit_bytes=vmem_limit),
    )(*args)
    if Mp != M:
        out = out[:M]
    return out


# ---------------------------------------------------------------------------
# Conv / pool wrappers
# ---------------------------------------------------------------------------
def _patches(x, kh, kw, stride, pad):
    """(N,H,W,C) -> (N,Ho,Wo, C*kh*kw); channel-major (c, kh, kw) ordering."""
    return lax.conv_general_dilated_patches(
        x, filter_shape=(kh, kw), window_strides=(stride, stride),
        padding=((pad, pad), (pad, pad)),
        dimension_numbers=("NHWC", "HWIO", "NHWC"))


def conv_bn(x, wmat, bias, kh, kw, *, stride=1, pad=0, relu=True,
            residual=None):
    """x: NHWC bf16; wmat: (K >= Cin*kh*kw, Cout) bf16 with BN folded in."""
    N, H, W, Cin = x.shape
    Cout = wmat.shape[1]
    if kh == 1 and kw == 1 and pad == 0:
        if stride != 1:
            x = x[:, ::stride, ::stride, :]
        Ho, Wo = x.shape[1], x.shape[2]
        patches = x.reshape(N * Ho * Wo, Cin)          # pure reshape, no copy
    else:
        p = _patches(x, kh, kw, stride, pad)
        Ho, Wo = p.shape[1], p.shape[2]
        patches = p.reshape(N * Ho * Wo, kh * kw * Cin)
    Kw = wmat.shape[0]
    if Kw != patches.shape[1]:                # weight K padded at init (conv1)
        patches = jnp.pad(patches, ((0, 0), (0, Kw - patches.shape[1])))
    M = N * Ho * Wo
    res = None if residual is None else residual.reshape(M, Cout)
    out = matmul_bias(patches, wmat, bias, relu=relu, residual=res)
    return out.reshape(N, Ho, Wo, Cout)


def maxpool_3x3_s2(x):
    """3x3 / stride-2 / pad-1 max pool, one fused reduce_window (no 9x stack).

    -inf padding matches PyTorch MaxPool2d semantics exactly.
    """
    return lax.reduce_window(
        x, jnp.array(-jnp.inf, x.dtype), lax.max,
        window_dimensions=(1, 3, 3, 1), window_strides=(1, 2, 2, 1),
        padding=((0, 0), (1, 1), (1, 1), (0, 0)))


# ---------------------------------------------------------------------------
# ResNet-50 parameters (synthetic, deterministic) and forward
# ---------------------------------------------------------------------------
def _conv_params(key, cout, cin, kh, kw, pad_k_to=None):
    fan_in = cin * kh * kw
    w = jax.random.normal(key, (cout, cin, kh, kw), jnp.float32) * math.sqrt(
        2.0 / fan_in)
    # Folded eval-mode BatchNorm (gamma=1, beta=0, mean=0, var=1).
    scale = jnp.ones((cout,), jnp.float32)
    bias = jnp.zeros((cout,), jnp.float32)
    # (Cin,kh,kw,Cout) -> (Cin*kh*kw, Cout): matches the channel-major feature
    # ordering of conv_general_dilated_patches; fold BN scale, cast to bf16.
    wmat = jnp.transpose(w, (1, 2, 3, 0)).reshape(cin * kh * kw, cout)
    wmat = wmat * scale[None, :]
    if pad_k_to is not None and pad_k_to > wmat.shape[0]:
        wmat = jnp.pad(wmat, ((0, pad_k_to - wmat.shape[0]), (0, 0)))
    return {'w': wmat.astype(jnp.bfloat16), 'b': bias}


def init_params(key):
    keys = iter(jax.random.split(key, 64))
    # conv1: K = 3*7*7 = 147 zero-padded to 256 (lane-aligned x tiles; free).
    params = {'conv1': _conv_params(next(keys), 64, 3, 7, 7, pad_k_to=256),
              'layers': []}
    layers_cfg = [(64, 3), (128, 4), (256, 6), (512, 3)]
    inplanes = 64
    for planes, nblocks in layers_cfg:
        blocks = []
        for b in range(nblocks):
            blk = {
                'c1': _conv_params(next(keys), planes, inplanes, 1, 1),
                'c2': _conv_params(next(keys), planes, planes, 3, 3),
                'c3': _conv_params(next(keys), planes * 4, planes, 1, 1),
            }
            if b == 0:   # downsample branch (stride / channel change)
                blk['ds'] = _conv_params(next(keys), planes * 4, inplanes, 1, 1)
            blocks.append(blk)
            inplanes = planes * 4
        params['layers'].append(blocks)
    return params


def bottleneck_forward(x, blk, stride):
    if 'ds' in blk:
        identity = conv_bn(x, blk['ds']['w'], blk['ds']['b'], 1, 1,
                           stride=stride, relu=False)
    else:
        identity = x
    out = conv_bn(x, blk['c1']['w'], blk['c1']['b'], 1, 1, relu=True)
    out = conv_bn(out, blk['c2']['w'], blk['c2']['b'], 3, 3, stride=stride,
                  pad=1, relu=True)
    # residual add + ReLU fused inside the Pallas GEMM epilogue
    out = conv_bn(out, blk['c3']['w'], blk['c3']['b'], 1, 1, relu=False,
                  residual=identity)
    return out


def extractor_forward(params, x_nchw):
    """Matches Extractor.forward: returns f = [layer1..layer4 outputs] (NCHW).

    Note: activations are kept in bf16 between layers, so outputs deviate from
    a pure-f32 PyTorch Extractor by bf16-level error (intended trade-off).
    """
    x = jnp.transpose(x_nchw, (0, 2, 3, 1)).astype(jnp.bfloat16)  # NCHW->NHWC
    x = conv_bn(x, params['conv1']['w'], params['conv1']['b'], 7, 7,
                stride=2, pad=3, relu=True)                 # conv1 + bn1 + relu
    x = maxpool_3x3_s2(x)                                   # maxpool
    f = []
    for li, blocks in enumerate(params['layers']):
        for bi, blk in enumerate(blocks):
            stride = 2 if (bi == 0 and li > 0) else 1
            x = bottleneck_forward(x, blk, stride)
        f.append(jnp.transpose(x, (0, 3, 1, 2)).astype(jnp.float32))  # NCHW
    return f


# ---------------------------------------------------------------------------
# One-time layout self-check (guards the patches/weight K-ordering coupling)
# ---------------------------------------------------------------------------
def _check_patch_weight_layout():
    kx, kw_ = jax.random.split(jax.random.PRNGKey(42))
    cin, cout = 16, 32
    x = jax.random.normal(kx, (1, 8, 8, cin), jnp.float32).astype(jnp.bfloat16)
    w = (jax.random.normal(kw_, (cout, cin, 3, 3), jnp.float32) * 0.1
         ).astype(jnp.bfloat16)
    wmat = jnp.transpose(w, (1, 2, 3, 0)).reshape(cin * 9, cout)
    bias = jnp.zeros((cout,), jnp.float32)
    got = conv_bn(x, wmat, bias, 3, 3, stride=1, pad=1,
                  relu=False).astype(jnp.float32)
    ref = lax.conv_general_dilated(
        x.astype(jnp.float32),
        jnp.transpose(w, (2, 3, 1, 0)).astype(jnp.float32),
        window_strides=(1, 1), padding=((1, 1), (1, 1)),
        dimension_numbers=("NHWC", "HWIO", "NHWC"))
    err = float(jnp.max(jnp.abs(got - ref)))
    tol = 0.03 * float(jnp.max(jnp.abs(ref))) + 0.05
    assert err < tol, ("im2col / weight layout mismatch", err, tol)


if __name__ == "__main__":
    key = jax.random.PRNGKey(0)
    pkey, xkey = jax.random.split(key)

    _check_patch_weight_layout()

    params = init_params(pkey)
    x = jax.random.normal(xkey, (2, 3, 64, 64), jnp.float32)  # NCHW input

    fwd = jax.jit(extractor_forward)
    feats = jax.block_until_ready(fwd(params, x))

    expected = [(2, 256, 16, 16), (2, 512, 8, 8), (2, 1024, 4, 4),
                (2, 2048, 2, 2)]
    assert [tuple(f.shape) for f in feats] == expected, \
        [tuple(f.shape) for f in feats]
    assert all(bool(jnp.all(jnp.isfinite(f))) for f in feats)
    print("KERNEL_OK")
</pallas_src>

<mosaic_0001>
module attributes {stable_mosaic.version = 11 : i64} {
  func.func @_mm_bias_kernel(%arg0: i32, %arg1: i32, %arg2: memref<64x144xbf16, #tpu.memory_space<vmem>>, %arg3: memref<144x32xbf16, #tpu.memory_space<vmem>>, %arg4: memref<1x32xf32, #tpu.memory_space<vmem>>, %arg5: memref<64x32xbf16, #tpu.memory_space<vmem>>) attributes {dimension_semantics = [#tpu.dimension_semantics<parallel>, #tpu.dimension_semantics<parallel>], iteration_bounds = array<i64: 1, 1>, scalar_prefetch = 0 : i64, scratch_operands = 0 : i64, tpu.core_type = #tpu.core_type<tc>, window_params = [{transform_indices = @transform_0, window_bounds = array<i64: 64, 144>}, {transform_indices = @transform_1, window_bounds = array<i64: 144, 32>}, {transform_indices = @transform_2, window_bounds = array<i64: 1, 32>}, {transform_indices = @transform_3, window_bounds = array<i64: 64, 32>}]} {
    %c0 = arith.constant 0 : index
    %c0_0 = arith.constant 0 : index
    %0 = vector.load %arg2[%c0, %c0_0] : memref<64x144xbf16, #tpu.memory_space<vmem>>, vector<64x144xbf16>
    %c0_1 = arith.constant 0 : index
    %c0_2 = arith.constant 0 : index
    %1 = vector.load %arg3[%c0_1, %c0_2] : memref<144x32xbf16, #tpu.memory_space<vmem>>, vector<144x32xbf16>
    %cst = arith.constant dense<0.000000e+00> : vector<64x32xf32>
    %2 = tpu.matmul %0, %1, %cst {dimension_numbers = #tpu.dot_dimension_numbers<[1], [0], [0], [1], [0, 0, 1, 1], [], []>} : vector<64x144xbf16>, vector<144x32xbf16>, vector<64x32xf32> -> vector<64x32xf32>
    %c0_3 = arith.constant 0 : index
    %c0_4 = arith.constant 0 : index
    %3 = vector.load %arg4[%c0_3, %c0_4] : memref<1x32xf32, #tpu.memory_space<vmem>>, vector<1x32xf32>
    %4 = vector.broadcast %3 : vector<1x32xf32> to vector<64x32xf32>
    %5 = arith.addf %2, %4 : vector<64x32xf32>
    %6 = arith.truncf %5 : vector<64x32xf32> to vector<64x32xbf16>
    %c0_5 = arith.constant 0 : index
    %c0_6 = arith.constant 0 : index
    %7 = vector.load %arg5[%c0_5, %c0_6] : memref<64x32xbf16, #tpu.memory_space<vmem>>, vector<64x32xbf16>
    tpu.vector_store %arg5[%c0_5, %c0_6], %6 {strides = array<i32>} : memref<64x32xbf16, #tpu.memory_space<vmem>>, vector<64x32xbf16>,
    return
  }
  func.func @transform_0(%arg0: i32, %arg1: i32) -> (i32, i32) {
    %c0_i32 = arith.constant 0 : i32
    %c0_i32_0 = arith.constant 0 : i32
    return %arg0, %c0_i32 : i32, i32
  }
  func.func @transform_1(%arg0: i32, %arg1: i32) -> (i32, i32) {
    %c0_i32 = arith.constant 0 : i32
    %c0_i32_0 = arith.constant 0 : i32
    return %c0_i32, %arg1 : i32, i32
  }
  func.func @transform_2(%arg0: i32, %arg1: i32) -> (i32, i32) {
    %c0_i32 = arith.constant 0 : i32
    %c0_i32_0 = arith.constant 0 : i32
    return %c0_i32, %arg1 : i32, i32
  }
  func.func @transform_3(%arg0: i32, %arg1: i32) -> (i32, i32) {
    %c0_i32 = arith.constant 0 : i32
    return %arg0, %arg1 : i32, i32
  }
}

</mosaic_0001>

<bundles_post_ra>
// kernel: tpu_custom_call.1
= control target key start
LH: loop header
LB: loop body
LE: loop exit
PB: predicated region body
PF: predicated region fallthrough
CT: control target
= control target key end

     0   :  { %v339_v0 = vmov 0   ;;  %vm138_vm0 = vcmask 130048   ;;  %vm248_vm1 = vcmask 257024   ;;  %s450_s1 = inlined_call_operand.vmem [shape: bf16[144,32], index: 1, kind: input, shape index: {}]   ;;  %s451_s0 = inlined_call_operand.vmem [shape: bf16[64,144], index: 0, kind: input, shape index: {}]   ;;  %s452_s2 = inlined_call_operand.vmem [shape: f32[1,32], index: 2, kind: input, shape index: {}]   ;;  %s453_s3 = inlined_call_operand.vmem [shape: bf16[64,32], index: 3, kind: output, shape index: {}]  }
   0x1   :  { %151 = vmatprep.subr.bf16.mxu0 %v339_v0  ;;  %299 = vmatprep.subr.bf16.mxu1 %v339_v0  ;;  %v318_v1 = vld [vmem:[%s450_s1 + $0x38] sm:$0xff]   ;;  %v319_v2 = vld [vmem:[%s450_s1 + $0x30] sm:$0xff]   ;;  %v320_v3 = vld [vmem:[%s450_s1 + $0x28] sm:$0xff]  }
   0x2   :  { %152 = vmatpush1.bf16.msra.mxu0 %v318_v1  ;;  %308 = vmatpush1.bf16.msra.mxu1 %v318_v1  ;;  %v321_v4 = vld [vmem:[%s450_s1 + $0x20] sm:$0xff]   ;;  %v322_v7 = vld [vmem:[%s450_s1 + $0x18] sm:$0xff]   ;;  %v323_v8 = vld [vmem:[%s450_s1 + $0x10] sm:$0xff]  }
   0x3   :  { %153 = vmatprep.subr.bf16.mxu0 %v339_v0  ;;  %300 = vmatprep.subr.bf16.mxu1 %v339_v0  ;;  %v329_v5 = vld [vmem:[%s451_s0 + $0x4] ss:$8 sps:$4 sm:$0xff]   ;;  %v327_v12 = vld [vmem:[%s451_s0] ss:$8 sps:$4 sm:$0xff]   ;;  %v333_v14 = vld [vmem:[%s451_s0 + $0x14] ss:$8 sps:$4 sm:$0xff]  }
   0x4   :  { %v332_v6 = vld [vmem:[%s451_s0 + $0x24] ss:$8 sps:$4 sm:$0xff]   ;;  %279 = vmatprep.mubr.msk.bf16.mxu0 %vm138_vm0, %v329_v5  ;;  %v330_v13 = vld [vmem:[%s451_s0 + $0x20] ss:$8 sps:$4 sm:$0xff]   ;;  %v335_v15 = vld [vmem:[%s451_s0 + $0x34] ss:$8 sps:$4 sm:$0xff]  }
   0x5   :  { %281 = vmatprep.mubr.msk.bf16.mxu1 %vm138_vm0, %v332_v6  ;;  %v324_v9 = vld [vmem:[%s450_s1 + $0x8] sm:$0xff]   ;;  %v325_v10 = vld [vmem:[%s450_s1] sm:$0xff]   ;;  %v337_v16 = vld [vmem:[%s451_s0 + $0x10] ss:$8 sps:$4 sm:$0xff]  }
   0x6   :  { %154 = vmatpush1.bf16.msra.mxu0 %v319_v2  ;;  %309 = vmatpush1.bf16.msra.mxu1 %v319_v2  ;;  %v326_v11 = vld [vmem:[%s450_s1 + $0x40] sm:$0xff]   ;;  %v338_v17 = vld [vmem:[%s451_s0 + $0x30] ss:$8 sps:$4 sm:$0xff]  }
   0x7   :  { %155 = vmatprep.subr.bf16.mxu0 %v339_v0  ;;  %301 = vmatprep.subr.bf16.mxu1 %v339_v0  ;;  %v261_v18 = vld [vmem:[%s452_s2] ss:$0 sm:$0xff] }
   0xa   :  { %156 = vmatpush1.bf16.msra.mxu0 %v320_v3  ;;  %310 = vmatpush1.bf16.msra.mxu1 %v320_v3 }
   0xb   :  { %157 = vmatprep.subr.bf16.mxu0 %v339_v0  ;;  %302 = vmatprep.subr.bf16.mxu1 %v339_v0 }
   0xe   :  { %158 = vmatpush1.bf16.msra.mxu0 %v321_v4  ;;  %311 = vmatpush1.bf16.msra.mxu1 %v321_v4 }
   0xf   :  { %159 = vmatprep.subr.bf16.mxu0 %v339_v0  ;;  %303 = vmatprep.subr.bf16.mxu1 %v339_v0 }
  0x12   :  { %160 = vmatpush1.bf16.msra.mxu0 %v322_v7  ;;  %312 = vmatpush1.bf16.msra.mxu1 %v322_v7 }
  0x13   :  { %161 = vmatprep.subr.bf16.mxu0 %v339_v0  ;;  %304 = vmatprep.subr.bf16.mxu1 %v339_v0 }
  0x16   :  { %162 = vmatpush1.bf16.msra.mxu0 %v323_v8  ;;  %313 = vmatpush1.bf16.msra.mxu1 %v323_v8 }
  0x17   :  { %163 = vmatprep.subr.bf16.mxu0 %v339_v0  ;;  %305 = vmatprep.subr.bf16.mxu1 %v339_v0 }
  0x1a   :  { %164 = vmatpush1.bf16.msra.mxu0 %v324_v9  ;;  %314 = vmatpush1.bf16.msra.mxu1 %v324_v9 }
  0x1b   :  { %165 = vmatprep.subr.bf16.mxu0 %v339_v0  ;;  %306 = vmatprep.subr.bf16.mxu1 %v339_v0 }
  0x1e   :  { %166 = vmatpush1.bf16.msra.mxu0 %v325_v10  ;;  %315 = vmatpush1.bf16.msra.mxu1 %v325_v10 }
  0x1f   :  { %181 = vmatprep.subr.bf16.mxu0 %v339_v0  ;;  %307 = vmatprep.subr.bf16.mxu1 %v339_v0 }
  0x22   :  { %182 = vmatpush2.bf16.msra.mxu0 %v326_v11  ;;  %316 = vmatpush2.bf16.msra.mxu1 %v326_v11 }
  0x25   :  { %184 = vmatmul.mubr.bf16.vlgmr.msra.gmra.mxu0 %v327_v12  ;;  %200 = vmatmul.mubr.bf16.vlgmr.msra.gmra.mxu1 %v330_v13 }
  0x26   :  { %280 = vmatprep.mubr.msk.bf16.mxu0 %vm138_vm0, %v333_v14  ;;  %282 = vmatprep.mubr.msk.bf16.mxu1 %vm138_vm0, %v335_v15 }
  0x2d   :  { %192 = vmatmul.mubr.bf16.gmra.mxu0 %v337_v16  ;;  %208 = vmatmul.mubr.bf16.gmra.mxu1 %v338_v17 }
  0xe5   :  { %v185_v19 = vpop.f32.mrf.mxu0  ;;  %v201_v20 = vpop.f32.mrf.mxu1 }
  0xe6   :  { %v186_v21 = vadd.f32 %v261_v18, %v185_v19  ;;  %v202_v22 = vadd.f32 %v261_v18, %v201_v20 }
  0xe7   :  { %v187_v23 = vpop.f32.mrf.mxu0  ;;  %v203_v24 = vpop.f32.mrf.mxu1 }
  0xe8   :  { %v291_v25 = vpack.c.bf16 %v186_v21, %v186_v21  ;;  %v295_v26 = vpack.c.bf16 %v202_v22, %v202_v22 }
  0xe9   :  { %v188_v27 = vpop.f32.mrf.mxu0  ;;  %v204_v28 = vpop.f32.mrf.mxu1 }
  0xea   :  { %249 = vst.msk [vmem:[%s453_s3] sm:$0xf] %vm248_vm1, %v291_v25  ;;  %253 = vst.msk [vmem:[%s453_s3 + $0x10] sm:$0xf] %vm248_vm1, %v295_v26  ;;  %v189_v29 = vadd.f32 %v261_v18, %v188_v27  ;;  %v205_v30 = vadd.f32 %v261_v18, %v204_v28 }
  0xeb   :  { %v190_v31 = vpop.f32.mrf.mxu0  ;;  %v206_v32 = vpop.f32.mrf.mxu1 }
  0xec   :  { %v292_v33 = vpack.c.bf16 %v189_v29, %v189_v29  ;;  %v296_v34 = vpack.c.bf16 %v205_v30, %v205_v30 }
  0xed   :  { %v193_v35 = vpop.f32.mrf.mxu0  ;;  %v209_v36 = vpop.f32.mrf.mxu1 }
  0xee   :  { %250 = vst.msk [vmem:[%s453_s3 + $0x4] sm:$0xf] %vm248_vm1, %v292_v33  ;;  %254 = vst.msk [vmem:[%s453_s3 + $0x14] sm:$0xf] %vm248_vm1, %v296_v34  ;;  %v194_v37 = vadd.f32 %v261_v18, %v193_v35  ;;  %v210_v38 = vadd.f32 %v261_v18, %v209_v36 }
  0xef   :  { %v195_v39 = vpop.f32.mrf.mxu0  ;;  %v211_v40 = vpop.f32.mrf.mxu1 }
  0xf0   :  { %v293_v41 = vpack.c.bf16 %v194_v37, %v194_v37  ;;  %v297_v42 = vpack.c.bf16 %v210_v38, %v210_v38 }
  0xf1   :  { %v196_v43 = vpop.f32.mrf.mxu0  ;;  %v212_v44 = vpop.f32.mrf.mxu1 }
  0xf2   :  { %251 = vst.msk [vmem:[%s453_s3 + $0x8] sm:$0xf] %vm248_vm1, %v293_v41  ;;  %255 = vst.msk [vmem:[%s453_s3 + $0x18] sm:$0xf] %vm248_vm1, %v297_v42  ;;  %v197_v45 = vadd.f32 %v261_v18, %v196_v43  ;;  %v213_v46 = vadd.f32 %v261_v18, %v212_v44 }
  0xf3   :  { %v198_v47 = vpop.f32.mrf.mxu0  ;;  %v214_v48 = vpop.f32.mrf.mxu1 }
  0xf4   :  { %v294_v49 = vpack.c.bf16 %v197_v45, %v197_v45  ;;  %v298_v50 = vpack.c.bf16 %v213_v46, %v213_v46 }
  0xf6   :  { %252 = vst.msk [vmem:[%s453_s3 + $0xc] sm:$0xf] %vm248_vm1, %v294_v49  ;;  %256 = vst.msk [vmem:[%s453_s3 + $0x1c] sm:$0xf] %vm248_vm1, %v298_v50 }

</bundles_post_ra>
